<compile_context>
chip_gen: v6e
topology: v6e:2x2x1
jax: 0.10.0
libtpu: 0.0.40
codegen_flags: <defaults>
</compile_context>

<pallas_src>
import functools

import jax
import jax.numpy as jnp
from jax.experimental import pallas as pl
from jax.experimental.pallas import tpu as pltpu


FEAT_DIM = 512      # vgg16_bn backbone -> feat_dim = 512
HIDDEN = 256
NUM_CLASSES = 2
OUT_PAD = 128       # lane-dense packed output width (eye||mouth logits in cols 0:4)


def multitask_fused_kernel(feats_ref, w1_ref, b1_ref, w2_ref, b2_ref, out_ref,
                           *, inv_hw):
    """One batch tile: pool -> fused Linear+ReLU -> fused Linear -> packed logits."""
    # AdaptiveAvgPool2d(1): sum over the flattened spatial axis with f32
    # accumulation, then scale by 1/HW.  (TB, C)
    pooled = jnp.sum(feats_ref[...], axis=1, dtype=jnp.float32) * inv_hw

    # Layer 1, both heads fused along N (C -> 2*HIDDEN): bf16 operands on the
    # MXU, f32 accumulation.
    h = jnp.dot(pooled.astype(jnp.bfloat16), w1_ref[...],
                preferred_element_type=jnp.float32)          # (TB, 2*HIDDEN)
    h = jnp.maximum(h + b1_ref[...], 0.0)
    # Dropout(p=0.5) -> identity at inference time.

    # Layer 2: block-diagonal eye|mouth weights, zero-padded to 128 lanes.
    out = jnp.dot(h.astype(jnp.bfloat16), w2_ref[...],
                  preferred_element_type=jnp.float32)        # (TB, OUT_PAD)
    out_ref[...] = out + b2_ref[...]


def pack_params(params):
    """Fuse eye/mouth head params and cast weights to bf16 for the MXU."""
    (w1e, b1e, w2e, b2e, w1m, b1m, w2m, b2m) = params
    # Layer 1: concat along output dim -> (C, 2*HIDDEN).
    w1 = jnp.concatenate([w1e, w1m], axis=1).astype(jnp.bfloat16)
    b1 = jnp.concatenate([b1e, b1m], axis=1).astype(jnp.float32)       # (1, 2*HIDDEN)
    # Layer 2: block-diagonal, zero-padded to OUT_PAD lanes -> (2*HIDDEN, OUT_PAD).
    w2 = jnp.zeros((2 * HIDDEN, OUT_PAD), jnp.float32)
    w2 = w2.at[:HIDDEN, :NUM_CLASSES].set(w2e)
    w2 = w2.at[HIDDEN:, NUM_CLASSES:2 * NUM_CLASSES].set(w2m)
    w2 = w2.astype(jnp.bfloat16)
    b2 = jnp.zeros((1, OUT_PAD), jnp.float32)
    b2 = b2.at[0, :NUM_CLASSES].set(b2e[0])
    b2 = b2.at[0, NUM_CLASSES:2 * NUM_CLASSES].set(b2m[0])
    return w1, b1, w2, b2


def _choose_batch_tile(B, HW, C, feat_itemsize, max_tb):
    """Pick the batch tile so the *total* kernel VMEM footprint fits everywhere.

    Counts the sublane-padded, double-buffered feats block, the double-buffered
    (TB, OUT_PAD) f32 output block, the resident (double-buffered) weights and
    the f32 pooled/h/out temps.  Budget ~40 MiB -> safe on v7x's 64 MiB/TC and
    leaves v5e/v6e (128 MiB physical) plenty of headroom.
    """
    vmem_budget = 40 << 20
    hw_padded = -(-HW // 8) * 8                         # sublane padding of spatial axis
    weights_bytes = 2 * ((C * 2 * HIDDEN + 2 * HIDDEN * OUT_PAD) * 2   # bf16 weights
                         + (2 * HIDDEN + OUT_PAD) * 4)                 # f32 biases
    per_row = (2 * hw_padded * C * feat_itemsize        # feats double buffer
               + 2 * OUT_PAD * 4                        # output double buffer
               + (C + 2 * HIDDEN + OUT_PAD) * 4)        # pooled / h / out f32 temps
    tb = (vmem_budget - weights_bytes) // per_row
    tb = int(max(8, min(max_tb, (tb // 8) * 8)))
    return B if B <= tb else tb


def multitask_forward(feats_nhwc, params, *, max_batch_tile=256):
    """feats_nhwc: (B, H, W, C) backbone feature maps (channels-last).

    bf16 features are the recommended input contract (the kernel is HBM-bound
    on this stream); f32 also works.  Returns (eye_logits, mouth_logits),
    each (B, 2) float32.
    """
    B, H, W, C = feats_nhwc.shape
    HW = H * W

    w1, b1, w2, b2 = pack_params(params)
    assert w1.shape[0] == C, "feature channel dim must match head input dim"

    feats = feats_nhwc.reshape(B, HW, C)

    TB = _choose_batch_tile(B, HW, C, feats.dtype.itemsize, max_batch_tile)
    # No wrapper-side jnp.pad: the last partial tile's out-of-bounds rows read
    # garbage but the math is row-independent and Pallas masks the OOB output
    # writeback, so nothing leaks past out[:B].
    grid = (pl.cdiv(B, TB),)

    flops = (2 * B * C * (2 * HIDDEN)            # layer-1 matmul
             + 2 * B * (2 * HIDDEN) * OUT_PAD    # layer-2 matmul
             + B * HW * C)                       # spatial mean
    bytes_accessed = (feats.size * feats.dtype.itemsize
                      + w1.size * w1.dtype.itemsize + w2.size * w2.dtype.itemsize
                      + b1.size * 4 + b2.size * 4
                      + B * OUT_PAD * 4)

    kernel = functools.partial(multitask_fused_kernel, inv_hw=1.0 / HW)

    out = pl.pallas_call(
        kernel,
        out_shape=jax.ShapeDtypeStruct((B, OUT_PAD), jnp.float32),
        grid_spec=pltpu.PrefetchScalarGridSpec(
            num_scalar_prefetch=0,
            grid=grid,
            in_specs=[
                # feats: tiled over batch; weights/biases resident (same block every step)
                pl.BlockSpec((TB, HW, C), lambda i: (i, 0, 0)),
                pl.BlockSpec((C, 2 * HIDDEN), lambda i: (0, 0)),
                pl.BlockSpec((1, 2 * HIDDEN), lambda i: (0, 0)),
                pl.BlockSpec((2 * HIDDEN, OUT_PAD), lambda i: (0, 0)),
                pl.BlockSpec((1, OUT_PAD), lambda i: (0, 0)),
            ],
            out_specs=pl.BlockSpec((TB, OUT_PAD), lambda i: (i, 0)),
        ),
        compiler_params=pltpu.CompilerParams(
            dimension_semantics=("parallel",),      # megacore sharding on v7x
            vmem_limit_bytes=64 * 1024 * 1024,      # raise v5e's 16 MiB default; the
                                                    # 40 MiB tile budget keeps actual
                                                    # usage under v7x's 64 MiB/TC
        ),
        cost_estimate=pl.CostEstimate(
            flops=flops, transcendentals=0, bytes_accessed=bytes_accessed),
    )(feats, w1, b1, w2, b2)

    eye_logits = out[:, :NUM_CLASSES]
    mouth_logits = out[:, NUM_CLASSES:2 * NUM_CLASSES]
    return eye_logits, mouth_logits


def init_params(key):
    ks = jax.random.split(key, 8)

    def lin(kw, fan_in, fan_out):
        scale = (2.0 / fan_in) ** 0.5
        return jax.random.normal(kw, (fan_in, fan_out), jnp.float32) * scale

    w1e = lin(ks[0], FEAT_DIM, HIDDEN)
    b1e = jnp.zeros((1, HIDDEN), jnp.float32)
    w2e = lin(ks[1], HIDDEN, NUM_CLASSES)
    b2e = jnp.zeros((1, NUM_CLASSES), jnp.float32)
    w1m = lin(ks[2], FEAT_DIM, HIDDEN)
    b1m = jnp.zeros((1, HIDDEN), jnp.float32)
    w2m = lin(ks[3], HIDDEN, NUM_CLASSES)
    b2m = jnp.zeros((1, NUM_CLASSES), jnp.float32)
    return (w1e, b1e, w2e, b2e, w1m, b1m, w2m, b2m)


def reference_forward(feats_nhwc, params):
    """Pure-JAX reference mirroring the kernel's bf16-operand / f32-accumulate math."""
    (w1e, b1e, w2e, b2e, w1m, b1m, w2m, b2m) = params
    pooled = jnp.mean(feats_nhwc.astype(jnp.float32), axis=(1, 2))   # (B, C)

    def bf(x):
        return x.astype(jnp.bfloat16)

    def head(w1, b1, w2, b2):
        h = jnp.dot(bf(pooled), bf(w1), preferred_element_type=jnp.float32) + b1
        h = jnp.maximum(h, 0.0)
        return jnp.dot(bf(h), bf(w2), preferred_element_type=jnp.float32) + b2

    return head(w1e, b1e, w2e, b2e), head(w1m, b1m, w2m, b2m)


if __name__ == "__main__":
    key = jax.random.PRNGKey(0)
    k_feat, k_feat2, k_param = jax.random.split(key, 3)

    params = init_params(k_param)

    # --- small backbone feature map, bf16 features (recommended contract) ----
    B, H, W = 2, 4, 4
    feats = jax.random.normal(k_feat, (B, H, W, FEAT_DIM), jnp.bfloat16)

    eye_logits, mouth_logits = multitask_forward(feats, params)
    jax.block_until_ready((eye_logits, mouth_logits))

    eye_ref, mouth_ref = reference_forward(feats, params)
    assert eye_logits.shape == (B, NUM_CLASSES)
    assert mouth_logits.shape == (B, NUM_CLASSES)
    assert jnp.allclose(eye_logits, eye_ref, atol=2e-2, rtol=2e-2), (
        float(jnp.max(jnp.abs(eye_logits - eye_ref))))
    assert jnp.allclose(mouth_logits, mouth_ref, atol=2e-2, rtol=2e-2), (
        float(jnp.max(jnp.abs(mouth_logits - mouth_ref))))

    # --- ragged-batch test: B % TB != 0 exercises the un-padded partial tile --
    B2, H2, W2 = 19, 6, 6
    feats2 = jax.random.normal(k_feat2, (B2, H2, W2, FEAT_DIM), jnp.bfloat16)

    eye2, mouth2 = multitask_forward(feats2, params, max_batch_tile=8)  # 19 = 2*8 + 3
    jax.block_until_ready((eye2, mouth2))

    eye2_ref, mouth2_ref = reference_forward(feats2, params)
    assert eye2.shape == (B2, NUM_CLASSES) and mouth2.shape == (B2, NUM_CLASSES)
    assert jnp.allclose(eye2, eye2_ref, atol=2e-2, rtol=2e-2), (
        float(jnp.max(jnp.abs(eye2 - eye2_ref))))
    assert jnp.allclose(mouth2, mouth2_ref, atol=2e-2, rtol=2e-2), (
        float(jnp.max(jnp.abs(mouth2 - mouth2_ref))))

    print("KERNEL_OK")
</pallas_src>

<mosaic_0001>
module attributes {stable_mosaic.version = 11 : i64} {
  func.func @multitask_fused_kernel(%arg0: i32, %arg1: memref<2x16x512xbf16, #tpu.memory_space<vmem>>, %arg2: memref<512x512xbf16, #tpu.memory_space<vmem>>, %arg3: memref<1x512xf32, #tpu.memory_space<vmem>>, %arg4: memref<512x128xbf16, #tpu.memory_space<vmem>>, %arg5: memref<1x128xf32, #tpu.memory_space<vmem>>, %arg6: memref<2x128xf32, #tpu.memory_space<vmem>>) attributes {dimension_semantics = [#tpu.dimension_semantics<parallel>], iteration_bounds = array<i64: 1>, scalar_prefetch = 0 : i64, scratch_operands = 0 : i64, tpu.core_type = #tpu.core_type<tc>, window_params = [{transform_indices = @transform_0, window_bounds = array<i64: 2, 16, 512>}, {pipeline_mode = #tpu.pipeline_mode<synchronous>, transform_indices = @transform_1, window_bounds = array<i64: 512, 512>}, {pipeline_mode = #tpu.pipeline_mode<synchronous>, transform_indices = @transform_2, window_bounds = array<i64: 1, 512>}, {pipeline_mode = #tpu.pipeline_mode<synchronous>, transform_indices = @transform_3, window_bounds = array<i64: 512, 128>}, {pipeline_mode = #tpu.pipeline_mode<synchronous>, transform_indices = @transform_4, window_bounds = array<i64: 1, 128>}, {transform_indices = @transform_5, window_bounds = array<i64: 2, 128>}]} {
    %c0 = arith.constant 0 : index
    %c0_0 = arith.constant 0 : index
    %c0_1 = arith.constant 0 : index
    %0 = vector.load %arg1[%c0, %c0_0, %c0_1] : memref<2x16x512xbf16, #tpu.memory_space<vmem>>, vector<2x16x512xbf16>
    %1 = arith.extf %0 : vector<2x16x512xbf16> to vector<2x16x512xf32>
    %cst = arith.constant dense<0.000000e+00> : vector<2x512xf32>
    %2 = vector.multi_reduction <add>, %1, %cst [1] : vector<2x16x512xf32> to vector<2x512xf32>
    %cst_2 = arith.constant 6.250000e-02 : f32
    %3 = vector.broadcast %cst_2 : f32 to vector<2x512xf32>
    %4 = arith.mulf %2, %3 : vector<2x512xf32>
    %5 = arith.truncf %4 : vector<2x512xf32> to vector<2x512xbf16>
    %c0_3 = arith.constant 0 : index
    %c0_4 = arith.constant 0 : index
    %6 = vector.load %arg2[%c0_3, %c0_4] : memref<512x512xbf16, #tpu.memory_space<vmem>>, vector<512x512xbf16>
    %cst_5 = arith.constant dense<0.000000e+00> : vector<2x512xf32>
    %7 = tpu.matmul %5, %6, %cst_5 {dimension_numbers = #tpu.dot_dimension_numbers<[1], [0], [0], [1], [0, 0, 1, 1], [], []>} : vector<2x512xbf16>, vector<512x512xbf16>, vector<2x512xf32> -> vector<2x512xf32>
    %c0_6 = arith.constant 0 : index
    %c0_7 = arith.constant 0 : index
    %8 = vector.load %arg3[%c0_6, %c0_7] : memref<1x512xf32, #tpu.memory_space<vmem>>, vector<1x512xf32>
    %9 = vector.broadcast %8 : vector<1x512xf32> to vector<2x512xf32>
    %10 = arith.addf %7, %9 : vector<2x512xf32>
    %cst_8 = arith.constant 0.000000e+00 : f32
    %11 = vector.broadcast %cst_8 : f32 to vector<2x512xf32>
    %12 = arith.maximumf %10, %11 : vector<2x512xf32>
    %13 = arith.truncf %12 : vector<2x512xf32> to vector<2x512xbf16>
    %c0_9 = arith.constant 0 : index
    %c0_10 = arith.constant 0 : index
    %14 = vector.load %arg4[%c0_9, %c0_10] : memref<512x128xbf16, #tpu.memory_space<vmem>>, vector<512x128xbf16>
    %cst_11 = arith.constant dense<0.000000e+00> : vector<2x128xf32>
    %15 = tpu.matmul %13, %14, %cst_11 {dimension_numbers = #tpu.dot_dimension_numbers<[1], [0], [0], [1], [0, 0, 1, 1], [], []>} : vector<2x512xbf16>, vector<512x128xbf16>, vector<2x128xf32> -> vector<2x128xf32>
    %c0_12 = arith.constant 0 : index
    %c0_13 = arith.constant 0 : index
    %16 = vector.load %arg5[%c0_12, %c0_13] : memref<1x128xf32, #tpu.memory_space<vmem>>, vector<1x128xf32>
    %17 = vector.broadcast %16 : vector<1x128xf32> to vector<2x128xf32>
    %18 = arith.addf %15, %17 : vector<2x128xf32>
    %c0_14 = arith.constant 0 : index
    %c0_15 = arith.constant 0 : index
    %19 = vector.load %arg6[%c0_14, %c0_15] : memref<2x128xf32, #tpu.memory_space<vmem>>, vector<2x128xf32>
    tpu.vector_store %arg6[%c0_14, %c0_15], %18 {strides = array<i32>} : memref<2x128xf32, #tpu.memory_space<vmem>>, vector<2x128xf32>,
    return
  }
  func.func @transform_0(%arg0: i32) -> (i32, i32, i32) {
    %c0_i32 = arith.constant 0 : i32
    %c0_i32_0 = arith.constant 0 : i32
    %c0_i32_1 = arith.constant 0 : i32
    return %arg0, %c0_i32, %c0_i32_0 : i32, i32, i32
  }
  func.func @transform_1(%arg0: i32) -> (i32, i32) {
    %c0_i32 = arith.constant 0 : i32
    %c0_i32_0 = arith.constant 0 : i32
    %c0_i32_1 = arith.constant 0 : i32
    return %c0_i32, %c0_i32_0 : i32, i32
  }
  func.func @transform_2(%arg0: i32) -> (i32, i32) {
    %c0_i32 = arith.constant 0 : i32
    %c0_i32_0 = arith.constant 0 : i32
    %c0_i32_1 = arith.constant 0 : i32
    return %c0_i32, %c0_i32_0 : i32, i32
  }
  func.func @transform_3(%arg0: i32) -> (i32, i32) {
    %c0_i32 = arith.constant 0 : i32
    %c0_i32_0 = arith.constant 0 : i32
    %c0_i32_1 = arith.constant 0 : i32
    return %c0_i32, %c0_i32_0 : i32, i32
  }
  func.func @transform_4(%arg0: i32) -> (i32, i32) {
    %c0_i32 = arith.constant 0 : i32
    %c0_i32_0 = arith.constant 0 : i32
    %c0_i32_1 = arith.constant 0 : i32
    return %c0_i32, %c0_i32_0 : i32, i32
  }
  func.func @transform_5(%arg0: i32) -> (i32, i32) {
    %c0_i32 = arith.constant 0 : i32
    %c0_i32_0 = arith.constant 0 : i32
    return %arg0, %c0_i32 : i32, i32
  }
}

</mosaic_0001>

<bundles_post_ra>
// kernel: tpu_custom_call.1
= control target key start
LH: loop header
LB: loop body
LE: loop exit
PB: predicated region body
PF: predicated region fallthrough
CT: control target
= control target key end

     0   :  { %10 = vsyncpa [#allocation3], 0  ;;  %s2138_s0 = inlined_call_operand.hbm [shape: bf16[2,16,512], index: 0, kind: input, shape index: {}]   ;;  %s2139_s1 = inlined_call_operand.hbm [shape: bf16[512,512], index: 1, kind: input, shape index: {}]   ;;  %s2140_s2 = inlined_call_operand.hbm [shape: f32[1,512], index: 2, kind: input, shape index: {}]   ;;  %s2141_s3 = inlined_call_operand.hbm [shape: bf16[512,128], index: 3, kind: input, shape index: {}]   ;;  %s2142_s4 = inlined_call_operand.vmem [shape: f32[1,128], index: 4, kind: input, shape index: {}]   ;;  %s2143_s5 = inlined_call_operand.hbm [shape: f32[2,128], index: 5, kind: output, shape index: {}]  }
   0x1   :  { %11 = vsyncpa [#allocation6], 0 }
   0x2   :  { %12 = vsyncpa [#allocation9], 0 }
   0x3   :  { %13 = vsyncpa [#allocation4], 0  ;;  %s2069_s18 = smov [#allocation5]   ;;  %s2070_s20 = smov [#allocation2]  }
   0x4   :  { %s31_s19 = sshll.u32 %s2069_s18, 4  ;;  %s19_s21 = sshll.u32 %s2070_s20, 4  ;;  %s32_s19 = int_to_ptr.vmem [resolvable:$true] %s31_s19  ;;  %s20_s21 = int_to_ptr.vmem [resolvable:$true] %s19_s21 }
   0x5   :  { %s1969_s22 = scalar_lea.vmem %s32_s19, 16384  ;;  %p1974_p1 = scmp.lt.s32.totalorder %s32_s19, %s32_s19 }
   0x6   :  { %p1970_p0 = scmp.ne.s32.totalorder %s32_s19, %s1969_s22  ;;  %p1975_p2 = scmp.lt.s32.totalorder %s1969_s22, %s1969_s22 }
   0x8   :  { %p1976_p3 = por %p1975_p2, %p1974_p1 }
   0xa   :  { %p1977_p4 = pnand %p1976_p3, %p1970_p0 }
   0xc   :  { %1980 = shalt.err (!%p1977_p4)
}
   0xd   :  { %s2071_s23 = smov 256   ;;  %s2072_s24 = smov 16  }
   0xe   :  { %37 = dma.hbm_to_vmem [thread:$0]  %s2139_s1, 16384, %s32_s19, [#allocation6], %s2071_s23, %s2071_s23, %s2072_s24  }
   0xf   :  { %s1989_s27 = scalar_lea.vmem %s20_s21, 1024  ;;  %p1994_p6 = scmp.lt.s32.totalorder %s20_s21, %s20_s21 }
  0x10   :  { %p1990_p5 = scmp.ne.s32.totalorder %s20_s21, %s1989_s27  ;;  %p1995_p7 = scmp.lt.s32.totalorder %s1989_s27, %s1989_s27 }
  0x12   :  { %p1996_p8 = por %p1995_p7, %p1994_p6 }
  0x14   :  { %p1997_p9 = pnand %p1996_p8, %p1990_p5 }
  0x16   :  { %2000 = shalt.err (!%p1997_p9)
}
  0x17   :  { %25 = dma.hbm_to_vmem [thread:$0]  %s2138_s0, 1024, %s20_s21, [#allocation3], %s2071_s23, %s2071_s23, %s2072_s24  }
  0x18   :  { %s2073_s30 = smov [#allocation7]   ;;  %s2074_s7 = smov [#allocation8]  }
  0x19   :  { %s44_s6 = sshll.u32 %s2073_s30, 4  ;;  %s53_s8 = sshll.u32 %s2074_s7, 4  ;;  %s45_s6 = int_to_ptr.vmem [resolvable:$true] %s44_s6  ;;  %s54_s8 = int_to_ptr.vmem [resolvable:$true] %s53_s8 }
  0x1a   :  { %s2009_s9 = scalar_lea.vmem %s45_s6, 64  ;;  %p2014_p11 = scmp.lt.s32.totalorder %s45_s6, %s45_s6 }
  0x1b   :  { %p2010_p10 = scmp.ne.s32.totalorder %s45_s6, %s2009_s9  ;;  %p2015_p12 = scmp.lt.s32.totalorder %s2009_s9, %s2009_s9 }
  0x1d   :  { %p2016_p13 = por %p2015_p12, %p2014_p11 }
  0x1f   :  { %p2017_p0 = pnand %p2016_p13, %p2010_p10 }
  0x21   :  { %2020 = shalt.err (!%p2017_p0)
}
  0x22   :  { %47 = dma.hbm_to_vmem [thread:$0]  %s2140_s2, 64, %s45_s6, [#allocation6]  }
  0x23   :  { %s2029_s11 = scalar_lea.vmem %s54_s8, 4096  ;;  %p2034_p2 = scmp.lt.s32.totalorder %s54_s8, %s54_s8 }
  0x24   :  { %p2030_p1 = scmp.ne.s32.totalorder %s54_s8, %s2029_s11  ;;  %p2035_p3 = scmp.lt.s32.totalorder %s2029_s11, %s2029_s11 }
  0x26   :  { %p2036_p4 = por %p2035_p3, %p2034_p2 }
  0x28   :  { %p2037_p5 = pnand %p2036_p4, %p2030_p1 }
  0x2a   :  { %2040 = shalt.err (!%p2037_p5)
}
  0x2b   :  { %s2075_s0 = smov 64   ;;  %s2076_s12 = smov 4  }
  0x2c   :  { %59 = dma.hbm_to_vmem [thread:$0]  %s2141_s3, 4096, %s54_s8, [#allocation9], %s2075_s0, %s2075_s0, %s2076_s12  }
  0x2d   :  { %2061 = dma.done.wait [#allocation3], 1024  }
  0x2e   :  { %2062 = vsyncadd [#allocation3], 4294966272 }
  0x2f   :  { %2063 = dma.done.wait [#allocation6], 16448  }
  0x30   :  { %2064 = vsyncadd [#allocation6], 4294950848 }
  0x31   :  { %2065 = dma.done.wait [#allocation9], 4096  }
  0x32   :  { %2066 = vsyncadd [#allocation9], 4294963200  ;;  %v1737_v0 = vld [vmem:[#allocation5 + $0xe4] ss:$16 sps:$4 sm:$0xff]   ;;  %v1741_v2 = vld [vmem:[#allocation5 + $0xe0] ss:$16 sps:$4 sm:$0xff]  }
  0x33   :  { %v1739_v1 = vld [vmem:[#allocation5 + $0x2e4] ss:$16 sps:$4 sm:$0xff]   ;;  %990 = vmatprep.subr.bf16.mxu0 %v1737_v0  ;;  %v1742_v3 = vld [vmem:[#allocation5 + $0x2e0] ss:$16 sps:$4 sm:$0xff]   ;;  %v76_v60 = vld [vmem:[#allocation2 + $0x8] sm:$0xff]  ;;  %vm337_vm0 = vcmask 1041409  }
  0x34   :  { %1031 = vmatprep.subr.bf16.mxu1 %v1739_v1  ;;  %v1743_v4 = vld [vmem:[#allocation5 + $0xc4] ss:$16 sps:$4 sm:$0xff]   ;;  %991 = vmatpush1.bf16.msra.mxu0 %v1741_v2  ;;  %v1747_v6 = vld [vmem:[#allocation5 + $0xc0] ss:$16 sps:$4 sm:$0xff]   ;;  %v78_v61 = vld [vmem:[#allocation2 + $0x18] sm:$0xff]  ;;  %v85_v2 = vunpack.c.l.bf16 %v76_v60  ;;  %s2077_s15 = smov [#allocation10]  }
  0x35   :  { %1032 = vmatpush1.bf16.msra.mxu1 %v1742_v3  ;;  %v1745_v5 = vld [vmem:[#allocation5 + $0x2c4] ss:$16 sps:$4 sm:$0xff]   ;;  %992 = vmatprep.subr.bf16.mxu0 %v1743_v4  ;;  %v1748_v7 = vld [vmem:[#allocation5 + $0x2c0] ss:$16 sps:$4 sm:$0xff]   ;;  %v80_v62 = vld [vmem:[#allocation2 + $0x28] sm:$0xff]  ;;  %v86_v3 = vunpack.c.h.bf16 %v76_v60  ;;  %s1512_s16 = sshll.u32 %s2077_s15, 4  ;;  %s1513_s16 = int_to_ptr.vmem [resolvable:$true] %s1512_s16 }
  0x36   :  { %1033 = vmatprep.subr.bf16.mxu1 %v1745_v5  ;;  %v1749_v8 = vld [vmem:[#allocation5 + $0xa4] ss:$16 sps:$4 sm:$0xff]   ;;  %v1753_v10 = vld [vmem:[#allocation5 + $0xa0] ss:$16 sps:$4 sm:$0xff]   ;;  %v82_v1 = vld [vmem:[#allocation2 + $0x38] sm:$0xff]  ;;  %v89_v5 = vunpack.c.l.bf16 %v78_v61  ;;  %s2041_s17 = scalar_lea.vmem %s1513_s16, 32  ;;  %p2046_p7 = scmp.lt.s32.totalorder %s1513_s16, %s1513_s16 }
  0x37   :  { %v1751_v9 = vld [vmem:[#allocation5 + $0x2a4] ss:$16 sps:$4 sm:$0xff]   ;;  %v1754_v11 = vld [vmem:[#allocation5 + $0x2a0] ss:$16 sps:$4 sm:$0xff]   ;;  %p2042_p6 = scmp.ne.s32.totalorder %s1513_s16, %s2041_s17  ;;  %p2047_p8 = scmp.lt.s32.totalorder %s2041_s17, %s2041_s17 }
  0x38   :  { %993 = vmatpush1.bf16.msra.mxu0 %v1747_v6  ;;  %v1755_v12 = vld [vmem:[#allocation5 + $0x84] ss:$16 sps:$4 sm:$0xff]   ;;  %v1759_v14 = vld [vmem:[#allocation5 + $0x80] ss:$16 sps:$4 sm:$0xff]   ;;  %v90_v6 = vunpack.c.h.bf16 %v78_v61 }
  0x39   :  { %1034 = vmatpush1.bf16.msra.mxu1 %v1748_v7  ;;  %994 = vmatprep.subr.bf16.mxu0 %v1749_v8  ;;  %v1757_v13 = vld [vmem:[#allocation5 + $0x284] ss:$16 sps:$4 sm:$0xff]   ;;  %v1760_v15 = vld [vmem:[#allocation5 + $0x280] ss:$16 sps:$4 sm:$0xff]   ;;  %v93_v7 = vunpack.c.l.bf16 %v80_v62  ;;  %p2048_p9 = por %p2047_p8, %p2046_p7 }
  0x3a   :  { %1035 = vmatprep.subr.bf16.mxu1 %v1751_v9  ;;  %v1761_v16 = vld [vmem:[#allocation5 + $0x64] ss:$16 sps:$4 sm:$0xff]   ;;  %v1765_v18 = vld [vmem:[#allocation5 + $0x60] ss:$16 sps:$4 sm:$0xff]  }
  0x3b   :  { %v1763_v17 = vld [vmem:[#allocation5 + $0x264] ss:$16 sps:$4 sm:$0xff]   ;;  %v1766_v19 = vld [vmem:[#allocation5 + $0x260] ss:$16 sps:$4 sm:$0xff]   ;;  %p2049_p10 = pnand %p2048_p9, %p2042_p6 }
  0x3c   :  { %995 = vmatpush1.bf16.msra.mxu0 %v1753_v10  ;;  %v1767_v20 = vld [vmem:[#allocation5 + $0x44] ss:$16 sps:$4 sm:$0xff]   ;;  %v1771_v22 = vld [vmem:[#allocation5 + $0x40] ss:$16 sps:$4 sm:$0xff]  }
  0x3d   :  { %1036 = vmatpush1.bf16.msra.mxu1 %v1754_v11  ;;  %996 = vmatprep.subr.bf16.mxu0 %v1755_v12  ;;  %v1769_v21 = vld [vmem:[#allocation5 + $0x244] ss:$16 sps:$4 sm:$0xff]   ;;  %v1772_v23 = vld [vmem:[#allocation5 + $0x240] ss:$16 sps:$4 sm:$0xff]   ;;  %v94_v11 = vunpack.c.h.bf16 %v80_v62  ;;  %v97_v12 = vunpack.c.l.bf16 %v82_v1 }
  0x3e   :  { %1037 = vmatprep.subr.bf16.mxu1 %v1757_v13  ;;  %v1773_v24 = vld [vmem:[#allocation5 + $0x24] ss:$16 sps:$4 sm:$0xff]   ;;  %v1777_v26 = vld [vmem:[#allocation5 + $0x20] ss:$16 sps:$4 sm:$0xff]   ;;  %v98_v13 = vunpack.c.h.bf16 %v82_v1 }
  0x3f   :  { %v1775_v25 = vld [vmem:[#allocation5 + $0x224] ss:$16 sps:$4 sm:$0xff]   ;;  %v1778_v27 = vld [vmem:[#allocation5 + $0x220] ss:$16 sps:$4 sm:$0xff]  }
  0x40   :  { %997 = vmatpush1.bf16.msra.mxu0 %v1759_v14  ;;  %v1779_v28 = vld [vmem:[#allocation5 + $0x4] ss:$16 sps:$4 sm:$0xff]   ;;  %v1783_v30 = vld [vmem:[#allocation5] ss:$16 sps:$4 sm:$0xff]  }
  0x41   :  { %1038 = vmatpush1.bf16.msra.mxu1 %v1760_v15  ;;  %998 = vmatprep.subr.bf16.mxu0 %v1761_v16  ;;  %v1781_v29 = vld [vmem:[#allocation5 + $0x204] ss:$16 sps:$4 sm:$0xff]   ;;  %v1784_v31 = vld [vmem:[#allocation5 + $0x200] ss:$16 sps:$4 sm:$0xff]   ;;  %v120_v16 = vadd.f32 %v90_v6, %v86_v3 }
  0x42   :  { %1039 = vmatprep.subr.bf16.mxu1 %v1763_v17  ;;  %v1785_v32 = vld [vmem:[#allocation5 + $0x1e4] ss:$16 sps:$4 sm:$0xff]   ;;  %v1789_v34 = vld [vmem:[#allocation5 + $0x1e0] ss:$16 sps:$4 sm:$0xff]  }
  0x43   :  { %v1787_v33 = vld [vmem:[#allocation5 + $0x3e4] ss:$16 sps:$4 sm:$0xff]   ;;  %v1790_v35 = vld [vmem:[#allocation5 + $0x3e0] ss:$16 sps:$4 sm:$0xff]  }
  0x44   :  { %999 = vmatpush1.bf16.msra.mxu0 %v1765_v18  ;;  %v1791_v36 = vld [vmem:[#allocation5 + $0x1c4] ss:$16 sps:$4 sm:$0xff]   ;;  %v1795_v38 = vld [vmem:[#allocation5 + $0x1c0] ss:$16 sps:$4 sm:$0xff]  }
  0x45   :  { %1040 = vmatpush1.bf16.msra.mxu1 %v1766_v19  ;;  %1000 = vmatprep.subr.bf16.mxu0 %v1767_v20  ;;  %v1793_v37 = vld [vmem:[#allocation5 + $0x3c4] ss:$16 sps:$4 sm:$0xff]   ;;  %v1796_v39 = vld [vmem:[#allocation5 + $0x3c0] ss:$16 sps:$4 sm:$0xff]  }
  0x46   :  { %1041 = vmatprep.subr.bf16.mxu1 %v1769_v21  ;;  %v1797_v40 = vld [vmem:[#allocation5 + $0x1a4] ss:$16 sps:$4 sm:$0xff]   ;;  %v1801_v42 = vld [vmem:[#allocation5 + $0x1a0] ss:$16 sps:$4 sm:$0xff]   ;;  %v148_v21 = vadd.f32 %v98_v13, %v94_v11 }
  0x47   :  { %v1799_v41 = vld [vmem:[#allocation5 + $0x3a4] ss:$16 sps:$4 sm:$0xff]   ;;  %v1802_v43 = vld [vmem:[#allocation5 + $0x3a0] ss:$16 sps:$4 sm:$0xff]  }
  0x48   :  { %1001 = vmatpush1.bf16.msra.mxu0 %v1771_v22  ;;  %v1803_v44 = vld [vmem:[#allocation5 + $0x184] ss:$16 sps:$4 sm:$0xff]   ;;  %v1807_v46 = vld [vmem:[#allocation5 + $0x180] ss:$16 sps:$4 sm:$0xff]   ;;  %v113_v22 = vadd.f32 %v89_v5, %v85_v2 }
  0x49   :  { %1042 = vmatpush1.bf16.msra.mxu1 %v1772_v23  ;;  %1002 = vmatprep.subr.bf16.mxu0 %v1773_v24  ;;  %v1805_v45 = vld [vmem:[#allocation5 + $0x384] ss:$16 sps:$4 sm:$0xff]   ;;  %v1808_v47 = vld [vmem:[#allocation5 + $0x380] ss:$16 sps:$4 sm:$0xff]   ;;  %v141_v23 = vadd.f32 %v97_v12, %v93_v7 }
  0x4a   :  { %1043 = vmatprep.subr.bf16.mxu1 %v1775_v25  ;;  %v75_v48 = vld [vmem:[#allocation2] sm:$0xff]  ;;  %v77_v51 = vld [vmem:[#allocation2 + $0x10] sm:$0xff]  ;;  %v121_v25 = vrot.slane %v120_v16, 4 }
  0x4b   :  { %v1809_v49 = vld [vmem:[#allocation5 + $0x164] ss:$16 sps:$4 sm:$0xff]   ;;  %v83_v54 = vunpack.c.l.bf16 %v75_v48  ;;  %v84_v55 = vunpack.c.h.bf16 %v75_v48  ;;  %v87_v56 = vunpack.c.l.bf16 %v77_v51  ;;  %v88_v57 = vunpack.c.h.bf16 %v77_v51  ;;  %v1813_v8 = vld [vmem:[#allocation5 + $0x160] ss:$16 sps:$4 sm:$0xff]  }
  0x4c   :  { %1003 = vmatpush1.bf16.msra.mxu0 %v1777_v26  ;;  %v1811_v50 = vld [vmem:[#allocation5 + $0x364] ss:$16 sps:$4 sm:$0xff]   ;;  %v1814_v9 = vld [vmem:[#allocation5 + $0x360] ss:$16 sps:$4 sm:$0xff]  }
  0x4d   :  { %1044 = vmatpush1.bf16.msra.mxu1 %v1778_v27  ;;  %1004 = vmatprep.subr.bf16.mxu0 %v1779_v28  ;;  %v79_v52 = vld [vmem:[#allocation2 + $0x20] sm:$0xff]  ;;  %v81_v53 = vld [vmem:[#allocation2 + $0x30] sm:$0xff]  ;;  %v106_v4 = vadd.f32 %v88_v57, %v84_v55  ;;  %v99_v17 = vadd.f32 %v87_v56, %v83_v54 }
  0x4e   :  { %1045 = vmatprep.subr.bf16.mxu1 %v1781_v29  ;;  %v91_v58 = vunpack.c.l.bf16 %v79_v52  ;;  %v92_v59 = vunpack.c.h.bf16 %v79_v52  ;;  %v95_v63 = vunpack.c.l.bf16 %v81_v53  ;;  %v96_v0 = vunpack.c.h.bf16 %v81_v53  ;;  %v1815_v14 = vld [vmem:[#allocation5 + $0x144] ss:$16 sps:$4 sm:$0xff]   ;;  %v1825_v52 = vld [vmem:[#allocation5 + $0x120] ss:$16 sps:$4 sm:$0xff]  }
  0x4f   :  { %v107_v15 = vrot.slane %v106_v4, 4  ;;  %v1817_v19 = vld [vmem:[#allocation5 + $0x344] ss:$16 sps:$4 sm:$0xff]   ;;  %v100_v26 = vrot.slane %v99_v17, 4  ;;  %v149_v29 = vrot.slane %v148_v21, 4 }
  0x50   :  { %1005 = vmatpush1.bf16.msra.mxu0 %v1783_v30  ;;  %v134_v10 = vadd.f32 %v96_v0, %v92_v59  ;;  %v127_v18 = vadd.f32 %v95_v63, %v91_v58  ;;  %v114_v30 = vrot.slane %v113_v22, 4  ;;  %v1826_v53 = vld [vmem:[#allocation5 + $0x320] ss:$16 sps:$4 sm:$0xff]   ;;  %v1827_v58 = vld [vmem:[#allocation5 + $0x104] ss:$16 sps:$4 sm:$0xff]  }
  0x51   :  { %1046 = vmatpush1.bf16.msra.mxu1 %v1784_v31  ;;  %1006 = vmatprep.subr.bf16.mxu0 %v1785_v32  ;;  %v108_v24 = vadd.f32 %v107_v15, %v106_v4  ;;  %v142_v31 = vrot.slane %v141_v23, 4  ;;  %v1819_v32 = vld [vmem:[#allocation5 + $0x140] ss:$16 sps:$4 sm:$0xff]   ;;  %v1829_v59 = vld [vmem:[#allocation5 + $0x304] ss:$16 sps:$4 sm:$0xff]  }
  0x52   :  { %1047 = vmatprep.subr.bf16.mxu1 %v1787_v33  ;;  %v135_v20 = vrot.slane %v134_v10, 4  ;;  %v128_v27 = vrot.slane %v127_v18, 4  ;;  %v1820_v33 = vld [vmem:[#allocation5 + $0x340] ss:$16 sps:$4 sm:$0xff]  }
  0x53   :  { %v1831_v4 = vld [vmem:[#allocation5 + $0x100] ss:$16 sps:$4 sm:$0xff]  }
  0x54   :  { %1007 = vmatpush2.bf16.msra.mxu0 %v1789_v34  ;;  %v136_v28 = vadd.f32 %v135_v20, %v134_v10  ;;  %v109_v34 = vrot.slane %v108_v24, 2 }
  0x55   :  { %1048 = vmatpush2.bf16.msra.mxu1 %v1790_v35  ;;  %1008 = vmatprep.subr.bf16.mxu0 %v1791_v36  ;;  %v122_v35 = vadd.f32 %v121_v25, %v120_v16  ;;  %v101_v36 = vadd.f32 %v100_v26, %v99_v17 }
  0x56   :  { %1049 = vmatprep.subr.bf16.mxu1 %v1793_v37  ;;  %v129_v37 = vadd.f32 %v128_v27, %v127_v18  ;;  %v1835_v18 = vld [vmem:[#allocation5 + $0xec] ss:$16 sps:$4 sm:$0xff]  }
  0x58   :  { %1009 = vmatpush2.bf16.msra.mxu0 %v1795_v38  ;;  %v1821_v38 = vld [vmem:[#allocation5 + $0x124] ss:$16 sps:$4 sm:$0xff]  }
  0x59   :  { %1050 = vmatpush2.bf16.msra.mxu1 %v1796_v39  ;;  %1010 = vmatprep.subr.bf16.mxu0 %v1797_v40  ;;  %v1823_v39 = vld [vmem:[#allocation5 + $0x324] ss:$16 sps:$4 sm:$0xff]   ;;  %v137_v40 = vrot.slane %v136_v28, 2 }
  0x5a   :  { %1051 = vmatprep.subr.bf16.mxu1 %v1799_v41  ;;  %v150_v41 = vadd.f32 %v149_v29, %v148_v21 }
  0x5b   :  { %v138_v48 = vadd.f32 %v137_v40, %v136_v28 }
  0x5c   :  { %1011 = vmatpush2.bf16.msra.mxu0 %v1801_v42  ;;  %v115_v42 = vadd.f32 %v114_v30, %v113_v22 }
  0x5d   :  { %1052 = vmatpush2.bf16.msra.mxu1 %v1802_v43  ;;  %1012 = vmatprep.subr.bf16.mxu0 %v1803_v44  ;;  %v143_v43 = vadd.f32 %v142_v31, %v141_v23  ;;  %v110_v44 = vadd.f32 %v109_v34, %v108_v24  ;;  %v139_v60 = vrot.slane %v138_v48, 1 }
  0x5e   :  { %1053 = vmatprep.subr.bf16.mxu1 %v1805_v45  ;;  %v123_v45 = vrot.slane %v122_v35, 2 }
  0x5f   :  { %v144_v51 = vrot.slane %v143_v43, 2  ;;  %v111_v54 = vrot.slane %v110_v44, 1  ;;  %v140_v5 = vadd.f32 %v139_v60, %v138_v48  ;;  %v1848_v60 = vld [vmem:[#allocation5 + $0x2a8] ss:$16 sps:$4 sm:$0xff]  }
  0x60   :  { %1013 = vmatpush2.bf16.msra.mxu0 %v1807_v46  ;;  %v102_v46 = vrot.slane %v101_v36, 2  ;;  %v124_v55 = vadd.f32 %v123_v45, %v122_v35  ;;  %v1833_v45 = vld [vmem:[#allocation5 + $0xe8] ss:$16 sps:$4 sm:$0xff]  }
  0x61   :  { %1054 = vmatpush2.bf16.msra.mxu1 %v1808_v47  ;;  %1014 = vmatprep.subr.bf16.mxu0 %v1809_v49  ;;  %v130_v47 = vrot.slane %v129_v37, 2  ;;  %v151_v49 = vrot.slane %v150_v41, 2  ;;  %v145_v63 = vadd.f32 %v144_v51, %v143_v43  ;;  %v112_v0 = vadd.f32 %v111_v54, %v110_v44  ;;  %v1839_v54 = vld [vmem:[#allocation5 + $0xc8] ss:$16 sps:$4 sm:$0xff]  }
  0x62   :  { %1055 = vmatprep.subr.bf16.mxu1 %v1811_v50  ;;  %v116_v50 = vrot.slane %v115_v42, 2  ;;  %v103_v56 = vadd.f32 %v102_v46, %v101_v36  ;;  %v125_v1 = vrot.slane %v124_v55, 1 }
  0x63   :  { %v131_v57 = vadd.f32 %v130_v47, %v129_v37  ;;  %v152_v61 = vadd.f32 %v151_v49, %v150_v41  ;;  %v156_v10 = vmul.f32 0.0625, %v112_v0  ;;  %v1841_v49 = vld [vmem:[#allocation5 + $0xcc] ss:$16 sps:$4 sm:$0xff]   ;;  %v1854_v0 = vld [vmem:[#allocation5 + $0x288] ss:$16 sps:$4 sm:$0xff]  }
  0x64   :  { %1015 = vmatpush2.bf16.msra.mxu0 %v1813_v8  ;;  %v117_v62 = vadd.f32 %v116_v50, %v115_v42  ;;  %v104_v2 = vrot.slane %v103_v56, 1  ;;  %v146_v8 = vrot.slane %v145_v63, 1  ;;  %v126_v11 = vadd.f32 %v125_v1, %v124_v55  ;;  %v1847_v55 = vld [vmem:[#allocation5 + $0xac] ss:$16 sps:$4 sm:$0xff]  }
  0x65   :  { %1056 = vmatpush2.bf16.msra.mxu1 %v1814_v9  ;;  %1016 = vmatprep.subr.bf16.mxu0 %v1815_v14  ;;  %v132_v3 = vrot.slane %v131_v57, 1  ;;  %v153_v6 = vrot.slane %v152_v61, 1  ;;  %v1832_v9 = vld [vmem:[#allocation5 + $0x300] ss:$16 sps:$4 sm:$0xff]   ;;  %v160_v14 = vmul.f32 0.0625, %v140_v5  ;;  %v164_v20 = vpack.c.bf16 %v156_v10, %v156_v10 }
  0x66   :  { %1057 = vmatprep.subr.bf16.mxu1 %v1817_v19  ;;  %v118_v7 = vrot.slane %v117_v62, 1  ;;  %v105_v12 = vadd.f32 %v104_v2, %v103_v56  ;;  %v147_v17 = vadd.f32 %v146_v8, %v145_v63  ;;  %v1838_v19 = vld [vmem:[#allocation5 + $0x2ec] ss:$16 sps:$4 sm:$0xff]   ;;  %v158_v21 = vmul.f32 0.0625, %v126_v11  ;;  %v1842_v56 = vld [vmem:[#allocation5 + $0x2c8] ss:$16 sps:$4 sm:$0xff]  }
  0x67   :  { %v133_v13 = vadd.f32 %v132_v3, %v131_v57  ;;  %v154_v15 = vadd.f32 %v153_v6, %v152_v61  ;;  %v168_v24 = vpack.c.bf16 %v160_v14, %v160_v14  ;;  %v330_v28 = vunpack.c.l.b16 %v164_v20  ;;  %v1850_v57 = vld [vmem:[#allocation5 + $0x2ac] ss:$16 sps:$4 sm:$0xff]   ;;  %v1857_v2 = vld [vmem:[#allocation5 + $0x68] ss:$16 sps:$4 sm:$0xff]  }
  0x68   :  { %1017 = vmatpush2.bf16.msra.mxu0 %v1819_v32  ;;  %v119_v16 = vadd.f32 %v118_v7, %v117_v62  ;;  %v155_v22 = vmul.f32 0.0625, %v105_v12  ;;  %v161_v27 = vmul.f32 0.0625, %v147_v17  ;;  %v166_v29 = vpack.c.bf16 %v158_v21, %v158_v21  ;;  %v1856_v61 = vld [vmem:[#allocation5 + $0x28c] ss:$16 sps:$4 sm:$0xff]   ;;  %v1851_v62 = vld [vmem:[#allocation5 + $0x88] ss:$16 sps:$4 sm:$0xff]  }
  0x69   :  { %1058 = vmatpush2.bf16.msra.mxu1 %v1820_v33  ;;  %1018 = vmatprep.subr.bf16.mxu0 %v1821_v38  ;;  %v159_v23 = vmul.f32 0.0625, %v133_v13  ;;  %v162_v25 = vmul.f32 0.0625, %v154_v15  ;;  %v334_v32 = vunpack.c.l.b16 %v168_v24  ;;  %v1859_v63 = vld [vmem:[#allocation5 + $0x6c] ss:$16 sps:$4 sm:$0xff]   ;;  %v1863_v6 = vld [vmem:[#allocation5 + $0x48] ss:$16 sps:$4 sm:$0xff]  }
  0x6a   :  { %1059 = vmatprep.subr.bf16.mxu1 %v1823_v39  ;;  %v157_v26 = vmul.f32 0.0625, %v119_v16  ;;  %v163_v30 = vpack.c.bf16 %v155_v22, %v155_v22  ;;  %v169_v35 = vpack.c.bf16 %v161_v27, %v161_v27  ;;  %v332_v36 = vunpack.c.l.b16 %v166_v29  ;;  %v1862_v1 = vld [vmem:[#allocation5 + $0x26c] ss:$16 sps:$4 sm:$0xff]   ;;  %v1866_v7 = vld [vmem:[#allocation5 + $0x248] ss:$16 sps:$4 sm:$0xff]  }
  0x6b   :  { %v167_v31 = vpack.c.bf16 %v159_v23, %v159_v23  ;;  %v170_v33 = vpack.c.bf16 %v162_v25, %v162_v25  ;;  %v339_v39 = vsel %vm337_vm0, %v334_v32, %v330_v28  ;;  %v1865_v3 = vld [vmem:[#allocation5 + $0x4c] ss:$16 sps:$4 sm:$0xff]   ;;  %v1872_v11 = vld [vmem:[#allocation5 + $0x228] ss:$16 sps:$4 sm:$0xff]  }
  0x6c   :  { %1019 = vmatpush2.bf16.msra.mxu0 %v1825_v52  ;;  %v165_v34 = vpack.c.bf16 %v157_v26, %v157_v26  ;;  %v329_v37 = vunpack.c.l.b16 %v163_v30  ;;  %v335_v42 = vunpack.c.l.b16 %v169_v35  ;;  %v343_v43 = vpack.c.b16 %v339_v39, %v339_v39  ;;  %v1836_v52 = vld [vmem:[#allocation5 + $0x2e8] ss:$16 sps:$4 sm:$0xff]   ;;  %v1868_v5 = vld [vmem:[#allocation5 + $0x24c] ss:$16 sps:$4 sm:$0xff]  }
  0x6d   :  { %1060 = vmatpush2.bf16.msra.mxu1 %v1826_v53  ;;  %1020 = vmatprep.subr.bf16.mxu0 %v1827_v58  ;;  %v333_v38 = vunpack.c.l.b16 %v167_v31  ;;  %v336_v40 = vunpack.c.l.b16 %v170_v33  ;;  %v1844_v53 = vld [vmem:[#allocation5 + $0x2cc] ss:$16 sps:$4 sm:$0xff]   ;;  %v1845_v58 = vld [vmem:[#allocation5 + $0xa8] ss:$16 sps:$4 sm:$0xff]  }
  0x6e   :  { %1061 = vmatprep.subr.bf16.mxu1 %v1829_v59  ;;  %v331_v41 = vunpack.c.l.b16 %v165_v34  ;;  %1022 = vmatprep.mubr.bf16.mxu0 %v343_v43  ;;  %v1853_v59 = vld [vmem:[#allocation5 + $0x8c] ss:$16 sps:$4 sm:$0xff]   ;;  %v1875_v13 = vld [vmem:[#allocation5 + $0x8] ss:$16 sps:$4 sm:$0xff]  }
  0x6f   :  { %v338_v44 = vsel %vm337_vm0, %v333_v38, %v329_v37  ;;  %v341_v46 = vsel %vm337_vm0, %v336_v40, %v332_v36  ;;  %v1871_v8 = vld [vmem:[#allocation5 + $0x2c] ss:$16 sps:$4 sm:$0xff]   ;;  %v1878_v15 = vld [vmem:[#allocation5 + $0x208] ss:$16 sps:$4 sm:$0xff]  }
  0x70   :  { %1021 = vmatpush2.bf16.msra.mxu0 %v1831_v4  ;;  %v2123_v47 = vpack.c.b16 %v338_v44, %v338_v44  ;;  %v340_v48 = vsel %vm337_vm0, %v335_v42, %v331_v41  ;;  %v345_v50 = vpack.c.b16 %v341_v46, %v341_v46  ;;  %v1860_v4 = vld [vmem:[#allocation5 + $0x268] ss:$16 sps:$4 sm:$0xff]   ;;  %v1874_v10 = vld [vmem:[#allocation5 + $0x22c] ss:$16 sps:$4 sm:$0xff]  }
  0x71   :  { %1062 = vmatpush2.bf16.msra.mxu1 %v1832_v9  ;;  %1072 = vmatprep.subr.bf16.mxu0 %v1835_v18  ;;  %v2126_v51 = vpack.c.b16 %v340_v48, %v340_v48  ;;  %v1869_v9 = vld [vmem:[#allocation5 + $0x28] ss:$16 sps:$4 sm:$0xff]   ;;  %v1877_v12 = vld [vmem:[#allocation5 + $0xc] ss:$16 sps:$4 sm:$0xff]  }
  0x72   :  { %1113 = vmatprep.subr.bf16.mxu1 %v1838_v19  ;;  %1063 = vmatprep.mubr.bf16.mxu1 %v345_v50  ;;  %v1880_v14 = vld [vmem:[#allocation5 + $0x20c] ss:$16 sps:$4 sm:$0xff]   ;;  %v1881_v17 = vld [vmem:[#allocation5 + $0x1e8] ss:$16 sps:$4 sm:$0xff]  }
  0x73   :  { %1023 = vmatmul.mubr.bf16.vlgmr.msra.gmra.mxu0 %v2123_v47  ;;  %v1883_v16 = vld [vmem:[#allocation5 + $0x1ec] ss:$16 sps:$4 sm:$0xff]   ;;  %v1884_v19 = vld [vmem:[#allocation5 + $0x3e8] ss:$16 sps:$4 sm:$0xff]  }
  0x74   :  { %1073 = vmatpush1.bf16.msra.mxu0 %v1833_v45  ;;  %1064 = vmatmul.mubr.bf16.vlgmr.msra.gmra.mxu1 %v2126_v51  ;;  %v1886_v18 = vld [vmem:[#allocation5 + $0x3ec] ss:$16 sps:$4 sm:$0xff]   ;;  %v1887_v22 = vld [vmem:[#allocation5 + $0x1c8] ss:$16 sps:$4 sm:$0xff]  }
  0x75   :  { %1074 = vmatprep.subr.bf16.mxu0 %v1841_v49  ;;  %1114 = vmatpush1.bf16.msra.mxu1 %v1836_v52  ;;  %v1889_v20 = vld [vmem:[#allocation5 + $0x1cc] ss:$16 sps:$4 sm:$0xff]   ;;  %v1890_v24 = vld [vmem:[#allocation5 + $0x3c8] ss:$16 sps:$4 sm:$0xff]  }
  0x76   :  { %1104 = vmatprep.mubr.bf16.mxu0 %v343_v43  ;;  %1115 = vmatprep.subr.bf16.mxu1 %v1844_v53  ;;  %v1892_v21 = vld [vmem:[#allocation5 + $0x3cc] ss:$16 sps:$4 sm:$0xff]   ;;  %v1893_v26 = vld [vmem:[#allocation5 + $0x1a8] ss:$16 sps:$4 sm:$0xff]  }
  0x77   :  { %1145 = vmatprep.mubr.bf16.mxu1 %v345_v50  ;;  %v1895_v23 = vld [vmem:[#allocation5 + $0x1ac] ss:$16 sps:$4 sm:$0xff]   ;;  %v1896_v28 = vld [vmem:[#allocation5 + $0x3a8] ss:$16 sps:$4 sm:$0xff]  }
  0x78   :  { %1075 = vmatpush1.bf16.msra.mxu0 %v1839_v54  ;;  %v1898_v25 = vld [vmem:[#allocation5 + $0x3ac] ss:$16 sps:$4 sm:$0xff]   ;;  %v1899_v30 = vld [vmem:[#allocation5 + $0x188] ss:$16 sps:$4 sm:$0xff]  }
  0x79   :  { %1076 = vmatprep.subr.bf16.mxu0 %v1847_v55  ;;  %1116 = vmatpush1.bf16.msra.mxu1 %v1842_v56  ;;  %v1901_v27 = vld [vmem:[#allocation5 + $0x18c] ss:$16 sps:$4 sm:$0xff]   ;;  %v1902_v32 = vld [vmem:[#allocation5 + $0x388] ss:$16 sps:$4 sm:$0xff]  }
  0x7a   :  { %1117 = vmatprep.subr.bf16.mxu1 %v1850_v57  ;;  %v1904_v29 = vld [vmem:[#allocation5 + $0x38c] ss:$16 sps:$4 sm:$0xff]   ;;  %v1905_v34 = vld [vmem:[#allocation5 + $0x168] ss:$16 sps:$4 sm:$0xff]  }
  0x7b   :  { %v1907_v31 = vld [vmem:[#allocation5 + $0x16c] ss:$16 sps:$4 sm:$0xff]   ;;  %v1908_v36 = vld [vmem:[#allocation5 + $0x368] ss:$16 sps:$4 sm:$0xff]  }
  0x7c   :  { %1077 = vmatpush1.bf16.msra.mxu0 %v1845_v58  ;;  %v1910_v33 = vld [vmem:[#allocation5 + $0x36c] ss:$16 sps:$4 sm:$0xff]   ;;  %v1911_v38 = vld [vmem:[#allocation5 + $0x148] ss:$16 sps:$4 sm:$0xff]  }
  0x7d   :  { %1078 = vmatprep.subr.bf16.mxu0 %v1853_v59  ;;  %1118 = vmatpush1.bf16.msra.mxu1 %v1848_v60  ;;  %v1913_v35 = vld [vmem:[#allocation5 + $0x14c] ss:$16 sps:$4 sm:$0xff]   ;;  %v1914_v40 = vld [vmem:[#allocation5 + $0x348] ss:$16 sps:$4 sm:$0xff]  }
  0x7e   :  { %1119 = vmatprep.subr.bf16.mxu1 %v1856_v61  ;;  %v1916_v37 = vld [vmem:[#allocation5 + $0x34c] ss:$16 sps:$4 sm:$0xff]   ;;  %v1917_v42 = vld [vmem:[#allocation5 + $0x128] ss:$16 sps:$4 sm:$0xff]  }
  0x7f   :  { %v1919_v39 = vld [vmem:[#allocation5 + $0x12c] ss:$16 sps:$4 sm:$0xff]   ;;  %v1920_v44 = vld [vmem:[#allocation5 + $0x328] ss:$16 sps:$4 sm:$0xff]  }
  0x80   :  { %1079 = vmatpush1.bf16.msra.mxu0 %v1851_v62  ;;  %v1922_v41 = vld [vmem:[#allocation5 + $0x32c] ss:$16 sps:$4 sm:$0xff]   ;;  %v1923_v46 = vld [vmem:[#allocation5 + $0x108] ss:$16 sps:$4 sm:$0xff]  }
  0x81   :  { %1080 = vmatprep.subr.bf16.mxu0 %v1859_v63  ;;  %1120 = vmatpush1.bf16.msra.mxu1 %v1854_v0  ;;  %v1925_v43 = vld [vmem:[#allocation5 + $0x10c] ss:$16 sps:$4 sm:$0xff]   ;;  %v1926_v49 = vld [vmem:[#allocation5 + $0x308] ss:$16 sps:$4 sm:$0xff]  }
  0x82   :  { %1121 = vmatprep.subr.bf16.mxu1 %v1862_v1  ;;  %v1928_v45 = vld [vmem:[#allocation5 + $0x30c] ss:$16 sps:$4 sm:$0xff]   ;;  %v1931_v52 = vld [vmem:[#allocation8 + $0x70] sm:$0xff]   ;;  %v1935_v56 = vld [vmem:[#allocation8 + $0x60] sm:$0xff]  }
  0x83   :  { %v1929_v48 = vld [vmem:[#allocation8 + $0x78] sm:$0xff]   ;;  %v1932_v53 = vld [vmem:[#allocation8 + $0x30] sm:$0xff]   ;;  %v1933_v54 = vld [vmem:[#allocation8 + $0x68] sm:$0xff]  }
  0x84   :  { %1081 = vmatpush1.bf16.msra.mxu0 %v1857_v2  ;;  %v1930_v50 = vld [vmem:[#allocation8 + $0x38] sm:$0xff]   ;;  %v1934_v55 = vld [vmem:[#allocation8 + $0x28] sm:$0xff]   ;;  %v1936_v57 = vld [vmem:[#allocation8 + $0x20] sm:$0xff]  }
  0x85   :  { %1082 = vmatprep.subr.bf16.mxu0 %v1865_v3  ;;  %1122 = vmatpush1.bf16.msra.mxu1 %v1860_v4  ;;  %v1937_v58 = vld [vmem:[#allocation8 + $0x58] sm:$0xff]   ;;  %v1947_v61 = vld [vmem:[#allocation8 + $0xf0] sm:$0xff]   ;;  %v1949_v63 = vld [vmem:[#allocation8 + $0xe8] sm:$0xff]  }
  0x86   :  { %1123 = vmatprep.subr.bf16.mxu1 %v1868_v5  ;;  %v1945_v59 = vld [vmem:[#allocation8 + $0xf8] sm:$0xff]   ;;  %v1940_v0 = vld [vmem:[#allocation8 + $0x10] sm:$0xff]   ;;  %v1941_v1 = vld [vmem:[#allocation8 + $0x48] sm:$0xff]  }
  0x87   :  { %v1946_v60 = vld [vmem:[#allocation8 + $0xb8] sm:$0xff]   ;;  %v1950_v2 = vld [vmem:[#allocation8 + $0xa8] sm:$0xff]   ;;  %v1951_v3 = vld [vmem:[#allocation8 + $0xe0] sm:$0xff]  }
  0x88   :  { %1083 = vmatpush1.bf16.msra.mxu0 %v1863_v6  ;;  %v1938_v62 = vld [vmem:[#allocation8 + $0x18] sm:$0xff]   ;;  %v1942_v4 = vld [vmem:[#allocation8 + $0x8] sm:$0xff]   ;;  %v1943_v5 = vld [vmem:[#allocation8 + $0x40] sm:$0xff]  }
  0x89   :  { %1084 = vmatprep.subr.bf16.mxu0 %v1871_v8  ;;  %1124 = vmatpush1.bf16.msra.mxu1 %v1866_v7  ;;  %v1952_v6 = vld [vmem:[#allocation8 + $0xa0] sm:$0xff]   ;;  %v1953_v7 = vld [vmem:[#allocation8 + $0xd8] sm:$0xff]  }
  0x8a   :  { %1125 = vmatprep.subr.bf16.mxu1 %v1874_v10  ;;  %v1944_v8 = vld [vmem:[#allocation8] sm:$0xff]   ;;  %v1955_v10 = vld [vmem:[#allocation8 + $0xd0] sm:$0xff]  }
  0x8c   :  { %1085 = vmatpush1.bf16.msra.mxu0 %v1869_v9  ;;  %v1954_v9 = vld [vmem:[#allocation8 + $0x98] sm:$0xff]  }
  0x8d   :  { %1086 = vmatprep.subr.bf16.mxu0 %v1877_v12  ;;  %1126 = vmatpush1.bf16.msra.mxu1 %v1872_v11  ;;  %v1956_v11 = vld [vmem:[#allocation8 + $0x90] sm:$0xff]   ;;  %v1957_v12 = vld [vmem:[#allocation8 + $0xc8] sm:$0xff]  }
  0x8e   :  { %1127 = vmatprep.subr.bf16.mxu1 %v1880_v14  ;;  %v1959_v14 = vld [vmem:[#allocation8 + $0xc0] sm:$0xff]  }
  0x90   :  { %1087 = vmatpush1.bf16.msra.mxu0 %v1875_v13  ;;  %v1958_v13 = vld [vmem:[#allocation8 + $0x88] sm:$0xff]  }
  0x91   :  { %1088 = vmatprep.subr.bf16.mxu0 %v1883_v16  ;;  %1128 = vmatpush1.bf16.msra.mxu1 %v1878_v15  ;;  %v1960_v15 = vld [vmem:[#allocation8 + $0x80] sm:$0xff]   ;;  %v301_v16 = vlaneseq }
  0x92   :  { %1129 = vmatprep.subr.bf16.mxu1 %v1886_v18 }
  0x94   :  { %1089 = vmatpush2.bf16.msra.mxu0 %v1881_v17  ;;  %v302_v17 = vshrl.u32 %v301_v16, 7 }
  0x95   :  { %1090 = vmatprep.subr.bf16.mxu0 %v1889_v20  ;;  %1130 = vmatpush2.bf16.msra.mxu1 %v1884_v19  ;;  %v299_v19 = vld [vmem:[#allocation7] sm:$0xf] }
  0x96   :  { %1131 = vmatprep.subr.bf16.mxu1 %v1892_v21  ;;  %v303_v18 = vsub.s32 0, %v302_v17  ;;  %v307_v20 = vsub.s32 1, %v302_v17 }
  0x98   :  { %1091 = vmatpush2.bf16.msra.mxu0 %v1887_v22  ;;  %v304_v21 = vrot.slane %v299_v19, %v303_v18  ;;  %v308_v22 = vrot.slane %v299_v19, %v307_v20 }
  0x99   :  { %1092 = vmatprep.subr.bf16.mxu0 %v1895_v23  ;;  %1132 = vmatpush2.bf16.msra.mxu1 %v1890_v24 }
  0x9a   :  { %1133 = vmatprep.subr.bf16.mxu1 %v1898_v25 }
  0x9c   :  { %1093 = vmatpush2.bf16.msra.mxu0 %v1893_v26 }
  0x9d   :  { %1094 = vmatprep.subr.bf16.mxu0 %v1901_v27  ;;  %1134 = vmatpush2.bf16.msra.mxu1 %v1896_v28 }
  0x9e   :  { %1135 = vmatprep.subr.bf16.mxu1 %v1904_v29 }
  0xa0   :  { %1095 = vmatpush2.bf16.msra.mxu0 %v1899_v30 }
  0xa1   :  { %1096 = vmatprep.subr.bf16.mxu0 %v1907_v31  ;;  %1136 = vmatpush2.bf16.msra.mxu1 %v1902_v32 }
  0xa2   :  { %1137 = vmatprep.subr.bf16.mxu1 %v1910_v33 }
  0xa4   :  { %1097 = vmatpush2.bf16.msra.mxu0 %v1905_v34 }
  0xa5   :  { %1098 = vmatprep.subr.bf16.mxu0 %v1913_v35  ;;  %1138 = vmatpush2.bf16.msra.mxu1 %v1908_v36 }
  0xa6   :  { %1139 = vmatprep.subr.bf16.mxu1 %v1916_v37 }
  0xa8   :  { %1099 = vmatpush2.bf16.msra.mxu0 %v1911_v38 }
  0xa9   :  { %1100 = vmatprep.subr.bf16.mxu0 %v1919_v39  ;;  %1140 = vmatpush2.bf16.msra.mxu1 %v1914_v40  ;;  %v311_v39 = vsub.s32 2, %v302_v17  ;;  %v315_v40 = vsub.s32 3, %v302_v17 }
  0xaa   :  { %1141 = vmatprep.subr.bf16.mxu1 %v1922_v41 }
  0xab   :  { %v312_v41 = vrot.slane %v299_v19, %v311_v39 }
  0xac   :  { %1101 = vmatpush2.bf16.msra.mxu0 %v1917_v42  ;;  %v316_v42 = vrot.slane %v299_v19, %v315_v40 }
  0xad   :  { %1102 = vmatprep.subr.bf16.mxu0 %v1925_v43  ;;  %1142 = vmatpush2.bf16.msra.mxu1 %v1920_v44 }
  0xae   :  { %1143 = vmatprep.subr.bf16.mxu1 %v1928_v45 }
  0xb0   :  { %1103 = vmatpush2.bf16.msra.mxu0 %v1923_v46 }
  0xb1   :  { %1684 = vmatprep.subr.bf16.mxu0 %v1929_v48  ;;  %1144 = vmatpush2.bf16.msra.mxu1 %v1926_v49 }
  0xb2   :  { %1706 = vmatprep.subr.bf16.mxu1 %v1945_v59 }
  0xb3   :  { %1105 = vmatmul.mubr.bf16.vlgmr.msra.gmra.mxu0 %v2123_v47  ;;  %v1939_v47 = vld [vmem:[#allocation8 + $0x50] sm:$0xff]  }
  0xb4   :  { %1685 = vmatpush3.bf16.msra.mxu0 %v1930_v50  ;;  %1146 = vmatmul.mubr.bf16.vlgmr.msra.gmra.mxu1 %v2126_v51  ;;  %v1948_v51 = vld [vmem:[#allocation8 + $0xb0] sm:$0xff]  }
  0xb5   :  { %1686 = vmatprep.subr.bf16.mxu0 %v1931_v52  ;;  %1707 = vmatpush3.bf16.msra.mxu1 %v1946_v60 }
  0xb6   :  { %1708 = vmatprep.subr.bf16.mxu1 %v1947_v61 }
  0xb8   :  { %1687 = vmatpush3.bf16.msra.mxu0 %v1932_v53 }
  0xb9   :  { %1688 = vmatprep.subr.bf16.mxu0 %v1933_v54  ;;  %1709 = vmatpush3.bf16.msra.mxu1 %v1948_v51 }
  0xba   :  { %1710 = vmatprep.subr.bf16.mxu1 %v1949_v63 }
  0xbc   :  { %1689 = vmatpush3.bf16.msra.mxu0 %v1934_v55 }
  0xbd   :  { %1690 = vmatprep.subr.bf16.mxu0 %v1935_v56  ;;  %1711 = vmatpush3.bf16.msra.mxu1 %v1950_v2 }
  0xbe   :  { %1712 = vmatprep.subr.bf16.mxu1 %v1951_v3 }
  0xc0   :  { %1691 = vmatpush3.bf16.msra.mxu0 %v1936_v57 }
  0xc1   :  { %1692 = vmatprep.subr.bf16.mxu0 %v1937_v58  ;;  %1713 = vmatpush3.bf16.msra.mxu1 %v1952_v6 }
  0xc2   :  { %1714 = vmatprep.subr.bf16.mxu1 %v1953_v7 }
  0xc4   :  { %1693 = vmatpush3.bf16.msra.mxu0 %v1938_v62 }
  0xc5   :  { %1694 = vmatprep.subr.bf16.mxu0 %v1939_v47  ;;  %1715 = vmatpush3.bf16.msra.mxu1 %v1954_v9 }
  0xc6   :  { %1716 = vmatprep.subr.bf16.mxu1 %v1955_v10 }
  0xc8   :  { %1695 = vmatpush3.bf16.msra.mxu0 %v1940_v0  ;;  %v1651_v0 = vld [vmem:[%s2142_s4] ss:$0 sm:$0xff] }
  0xc9   :  { %1696 = vmatprep.subr.bf16.mxu0 %v1941_v1  ;;  %1717 = vmatpush3.bf16.msra.mxu1 %v1956_v11 }
  0xca   :  { %1718 = vmatprep.subr.bf16.mxu1 %v1957_v12 }
  0xcc   :  { %1697 = vmatpush3.bf16.msra.mxu0 %v1942_v4 }
  0xcd   :  { %1698 = vmatprep.subr.bf16.mxu0 %v1943_v5  ;;  %1719 = vmatpush3.bf16.msra.mxu1 %v1958_v13 }
  0xce   :  { %1720 = vmatprep.subr.bf16.mxu1 %v1959_v14 }
  0xd0   :  { %1699 = vmatpush3.bf16.msra.mxu0 %v1944_v8 }
  0xd1   :  { %1721 = vmatpush3.bf16.msra.mxu1 %v1960_v15 }
 0x133   :  { %v1024_v23 = vpop.f32.mrf.mxu0 }
 0x134   :  { %v1025_v24 = vadd.f32 %v1024_v23, %v304_v21  ;;  %v1065_v25 = vpop.f32.mrf.mxu1 }
 0x135   :  { %v1026_v26 = vpop.f32.mrf.mxu0 }
 0x136   :  { %v1066_v27 = vadd.f32 %v1065_v25, %v1025_v24  ;;  %v1027_v28 = vadd.f32 %v1026_v26, %v308_v22  ;;  %v1067_v29 = vpop.f32.mrf.mxu1 }
 0x137   :  { %v1028_v30 = vpop.f32.mrf.mxu0 }
 0x138   :  { %v1068_v31 = vadd.f32 %v1067_v29, %v1027_v28  ;;  %v1154_v32 = vmax.f32 %v1066_v27, 0.0  ;;  %v1069_v33 = vpop.f32.mrf.mxu1 }
 0x139   :  { %v1029_v34 = vpop.f32.mrf.mxu0 }
 0x13a   :  { %v1155_v35 = vmax.f32 %v1068_v31, 0.0  ;;  %v1070_v36 = vpop.f32.mrf.mxu1  ;;  %v1158_v38 = vpack.c.bf16 %v1154_v32, %v1154_v32 }
 0x13c   :  { %v1159_v37 = vpack.c.bf16 %v1155_v35, %v1155_v35 }
 0x13e   :  { %1457 = vmatprep.mubr.bf16.mxu0 %v1159_v37 }
 0x13f   :  { %1458 = vmatmul.mubr.bf16.vlgmr.msra.gmra.mxu0 %v1158_v38 }
 0x173   :  { %v1106_v43 = vpop.f32.mrf.mxu0 }
 0x174   :  { %v1107_v44 = vadd.f32 %v1106_v43, %v312_v41  ;;  %v1147_v45 = vpop.f32.mrf.mxu1 }
 0x175   :  { %v1108_v46 = vpop.f32.mrf.mxu0 }
 0x176   :  { %v1148_v48 = vadd.f32 %v1147_v45, %v1107_v44  ;;  %v1109_v49 = vadd.f32 %v1108_v46, %v316_v42  ;;  %v1149_v50 = vpop.f32.mrf.mxu1 }
 0x177   :  { %v1110_v52 = vpop.f32.mrf.mxu0 }
 0x178   :  { %v1150_v53 = vadd.f32 %v1149_v50, %v1109_v49  ;;  %v1156_v54 = vmax.f32 %v1148_v48, 0.0  ;;  %v1151_v55 = vpop.f32.mrf.mxu1 }
 0x179   :  { %v1111_v56 = vpop.f32.mrf.mxu0 }
 0x17a   :  { %v1157_v57 = vmax.f32 %v1150_v53, 0.0  ;;  %v1152_v58 = vpop.f32.mrf.mxu1  ;;  %v1160_v60 = vpack.c.bf16 %v1156_v54, %v1156_v54 }
 0x17c   :  { %v1161_v59 = vpack.c.bf16 %v1157_v57, %v1157_v57 }
 0x17e   :  { %1497 = vmatprep.mubr.bf16.mxu1 %v1161_v59 }
 0x17f   :  { %1498 = vmatmul.mubr.bf16.vlgmr.msra.gmra.mxu1 %v1160_v60 }
 0x1ff   :  { %v1700_v61 = vpop.f32.mrf.mxu0 }
 0x201   :  { %v1701_v62 = vpop.f32.mrf.mxu0 }
 0x202   :  { %v1702_v63 = vadd.f32 %v1701_v62, %v1700_v61 }
 0x203   :  { %v1703_v47 = vpop.f32.mrf.mxu0 }
 0x204   :  { %v1460_v3 = vadd.f32 %v1702_v63, %v1651_v0 }
 0x205   :  { %v1704_v51 = vpop.f32.mrf.mxu0 }
 0x23f   :  { %v1722_v1 = vpop.f32.mrf.mxu1 }
 0x241   :  { %v1723_v2 = vpop.f32.mrf.mxu1 }
 0x242   :  { %v1724_v4 = vadd.f32 %v1723_v2, %v1722_v1 }
 0x243   :  { %v1725_v5 = vpop.f32.mrf.mxu1 }
 0x244   :  { %v1500_v6 = vadd.f32 %v1724_v4, %v1460_v3 }
 0x245   :  { %v1726_v7 = vpop.f32.mrf.mxu1 }
 0x246   :  { %1505 = vst [vmem:[#allocation10] sm:$0x3] %v1500_v6 }
 0x247   :  { %2052 = shalt.err (!%p2049_p10)
}
 0x248   :  { %1515 = dma.vmem_to_hbm [thread:$0]  %s1513_s16, 32, %s2143_s5, [#allocation4]  }
 0x249   :  { %2067 = dma.done.wait [#allocation4], 32  }
 0x24a   :  { %2068 = vsyncadd [#allocation4], 4294967264 }
 0x24b   :  { %1519 = vsyncpa [#allocation3], 1 }
 0x24c   :  { %1520 = vsyncpa [#allocation6], 1 }
 0x24d   :  { %1521 = vsyncpa [#allocation9], 1 }
 0x24e   :  { %1522 = vsyncpa [#allocation4], 1 }

</bundles_post_ra>
